<compile_context>
chip_gen: v6e
topology: v6e:2x2x1
jax: 0.10.0
libtpu: 0.0.40
codegen_flags: <defaults>
</compile_context>

<pallas_src>
import functools

import jax
import jax.numpy as jnp
from jax.experimental import pallas as pl
from jax.experimental.pallas import tpu as pltpu


def _round_up(x, m):
    return ((x + m - 1) // m) * m


def _core_kernel(x_ref, w_ref, shift_ref, o_ref, p_ref, *,
                 B, K, Cin, Wp, Lt, n_lt, KKC, KKCpad):
    # x_ref:     (B, Cin, Lx)     flattened zero-padded images (compute dtype)
    # w_ref:     (Cout, KKCpad)   conv weight, BN scale folded, zero-padded cols
    # shift_ref: (Cout, 1)        beta - running_mean * scale (f32)
    # o_ref:     (B, Cout, Lt)    output tile on the padded spatial grid
    # p_ref:     (KKCpad, B*Lt)   VMEM scratch: im2col patches for this tile
    if n_lt == 1:
        col0 = 0                                   # fully static slicing
    else:
        col0 = pl.multiple_of(pl.program_id(1) * Lt, 128)

    # Keep the zero-padded contraction rows at exactly zero (avoid NaN*0).
    if KKCpad > KKC:
        p_ref[KKC:, :] = jnp.zeros((KKCpad - KKC, B * Lt), p_ref.dtype)

    # Build the im2col operand in VMEM: tap-major / cin-minor rows, one
    # 128-aligned column slab per image.  Each tap is a constant lane shift
    # of the flattened padded image (no reshapes, no HBM re-reads).
    for b in range(B):
        for kh in range(K):
            for kw in range(K):
                t = kh * K + kw
                s = kh * Wp + kw
                p_ref[t * Cin:(t + 1) * Cin, b * Lt:(b + 1) * Lt] = \
                    x_ref[b, :, pl.ds(col0 + s, Lt)]

    # One fused GEMM for the whole block; f32 accumulate on the MXU.
    y = jnp.dot(w_ref[...], p_ref[...], preferred_element_type=jnp.float32)
    # Epilogue: single broadcast BN shift + ReLU.
    y = jnp.maximum(y + shift_ref[...], 0.0).astype(o_ref.dtype)
    for b in range(B):
        o_ref[b] = y[:, b * Lt:(b + 1) * Lt]       # unmasked 128-aligned store


def task_driven_core2_forward(x_nchw, params, *, input_channels,
                              images_per_block=8, lane_tile=512,
                              compute_dtype=jnp.bfloat16,
                              out_dtype=jnp.float32,
                              vmem_limit_bytes=48 * 1024 * 1024):
    """x_nchw: (N, C, H, W) float32 (PyTorch layout). Returns (N, OUTCH, H, W)."""
    w = params["w"]
    gamma, beta = params["gamma"], params["beta"]
    run_mean, run_var, eps = params["running_mean"], params["running_var"], params["eps"]

    N, C, H, W = x_nchw.shape
    Cout, _, K, _ = w.shape
    assert K % 2 == 1, "Conv2d(padding=K//2) == SAME only holds for odd K"
    pad = K // 2

    # 1) greyscale -> RGB repeat folded into the weights (exact: channels identical).
    if input_channels == 1:
        w = jnp.sum(w, axis=1, keepdims=True)      # (Cout, 1, K, K)
    Cin = w.shape[1]
    assert C == Cin, (C, Cin)

    # 2) eval-mode BatchNorm folded: scale into weights, shift as epilogue bias.
    scale = gamma / jnp.sqrt(run_var + eps)                        # (Cout,)
    shift = (beta - run_mean * scale).reshape(Cout, 1).astype(jnp.float32)

    # Weight matrix: (Cout, KKC) with taps-major / cin-minor columns, zero-padded
    # to a sublane multiple so the contraction dim has no ragged tiles.
    KKC = K * K * Cin
    KKCpad = _round_up(KKC, 8)
    w_mat = jnp.transpose(w, (0, 2, 3, 1)).reshape(Cout, KKC) * scale[:, None]
    w_mat = jnp.pad(w_mat, ((0, 0), (0, KKCpad - KKC))).astype(compute_dtype)

    # 3) geometry on the flattened zero-padded spatial grid.
    Hp, Wp = H + 2 * pad, W + 2 * pad
    L_need = H * Wp                           # covers every valid output position
    Lt = min(max(128, (lane_tile // 128) * 128), _round_up(L_need, 128))
    n_lt = -(-L_need // Lt)                   # lane tiles per image
    Ltot = n_lt * Lt
    Smax = (K - 1) * Wp + (K - 1)             # largest tap shift
    Lx = _round_up(Ltot + Smax, 128)          # padded flattened image length

    # 4) batch blocking: B divides N (no padded tail images) and is capped at
    #    ceil(N/2) so n_blocks >= 2 whenever N >= 2 (megacore / pipelining).
    cap = max(1, min(images_per_block, (N + 1) // 2)) if N > 1 else 1
    B = next(b for b in range(cap, 0, -1) if N % b == 0)
    n_blocks = N // B

    # 5) image prep: zero-pad + flatten only — no K*K im2col in HBM.
    x_pad = jnp.pad(x_nchw, ((0, 0), (0, 0), (pad, pad), (pad, pad)))
    x_flat = x_pad.reshape(N, Cin, Hp * Wp)
    x_flat = jnp.pad(x_flat, ((0, 0), (0, 0), (0, Lx - Hp * Wp))).astype(compute_dtype)

    kernel = functools.partial(_core_kernel, B=B, K=K, Cin=Cin, Wp=Wp,
                               Lt=Lt, n_lt=n_lt, KKC=KKC, KKCpad=KKCpad)
    out = pl.pallas_call(
        kernel,
        out_shape=jax.ShapeDtypeStruct((N, Cout, Ltot), out_dtype),
        grid_spec=pltpu.PrefetchScalarGridSpec(
            num_scalar_prefetch=0,
            grid=(n_blocks, n_lt),
            in_specs=[
                # image block stays VMEM-resident across the lane-tile axis
                pl.BlockSpec((B, Cin, Lx), lambda n, j: (n, 0, 0)),
                pl.BlockSpec((Cout, KKCpad), lambda n, j: (0, 0)),
                pl.BlockSpec((Cout, 1), lambda n, j: (0, 0)),
            ],
            out_specs=pl.BlockSpec((B, Cout, Lt), lambda n, j: (n, 0, j)),
            scratch_shapes=[pltpu.VMEM((KKCpad, B * Lt), compute_dtype)],
        ),
        compiler_params=pltpu.CompilerParams(
            dimension_semantics=("parallel", "arbitrary"),
            vmem_limit_bytes=vmem_limit_bytes,
        ),
    )(x_flat, w_mat, shift)

    # (N, Cout, Ltot) on the padded grid -> (N, Cout, H, W): slice + reshape only.
    out = out[:, :, :H * Wp].reshape(N, Cout, H, Wp)[:, :, :, :W]
    return out


def _reference_forward(x_nchw, params, *, input_channels):
    """Pure-JAX reference matching the nn.Module forward exactly."""
    w = params["w"]
    gamma, beta = params["gamma"], params["beta"]
    mean, var, eps = params["running_mean"], params["running_var"], params["eps"]
    if input_channels == 1:
        x_nchw = jnp.tile(x_nchw, (1, 3, 1, 1))
    y = jax.lax.conv_general_dilated(
        x_nchw, w, window_strides=(1, 1), padding="SAME",
        dimension_numbers=("NCHW", "OIHW", "NCHW"),
        precision=jax.lax.Precision.HIGHEST)
    scale = gamma / jnp.sqrt(var + eps)
    y = y * scale[None, :, None, None] + (beta - mean * scale)[None, :, None, None]
    return jnp.maximum(y, 0.0)


def make_params(key, *, cin=3, cout=32, k=3):
    k1, k2, k3, k4, k5 = jax.random.split(key, 5)
    fan_in = cin * k * k
    fan_out = cout * k * k
    std = (2.0 / (fan_in + fan_out)) ** 0.5  # xavier_normal_
    w = jax.random.normal(k1, (cout, cin, k, k), jnp.float32) * std
    # bias=False in the module -> conv bias omitted entirely
    gamma = 1.0 + 0.1 * jax.random.normal(k2, (cout,), jnp.float32)
    beta = 0.1 * jax.random.normal(k3, (cout,), jnp.float32)
    running_mean = 0.1 * jax.random.normal(k4, (cout,), jnp.float32)
    running_var = 1.0 + 0.1 * jax.random.uniform(k5, (cout,), jnp.float32)
    return {
        "w": w,
        "gamma": gamma,
        "beta": beta,
        "running_mean": running_mean,
        "running_var": running_var,
        "eps": 1e-5,
    }


if __name__ == "__main__":
    key = jax.random.PRNGKey(0)
    kx, kp = jax.random.split(key)

    # input_channels = 1 exercises the greyscale -> RGB (weight-fold) path
    N, C, H, W = 2, 1, 16, 16
    OUTCH = 32
    x = jax.random.normal(kx, (N, C, H, W), jnp.float32)
    params = make_params(kp, cin=3, cout=OUTCH, k=3)

    ref = _reference_forward(x, params, input_channels=1)

    # f32 operands: tight check against the XLA reference.
    out_f32 = task_driven_core2_forward(x, params, input_channels=1,
                                        compute_dtype=jnp.float32)
    out_f32 = jax.block_until_ready(out_f32)
    assert out_f32.shape == (N, OUTCH, H, W), out_f32.shape
    assert bool(jnp.all(jnp.isfinite(out_f32)))
    assert bool(jnp.all(out_f32 >= 0.0))            # ReLU output is non-negative
    assert bool(jnp.allclose(out_f32, ref, atol=1e-3, rtol=1e-3)), \
        float(jnp.max(jnp.abs(out_f32 - ref)))

    # bf16 operands (default, halves operand HBM/VMEM traffic): looser check.
    out_bf16 = task_driven_core2_forward(x, params, input_channels=1,
                                         compute_dtype=jnp.bfloat16)
    out_bf16 = jax.block_until_ready(out_bf16)
    assert out_bf16.shape == (N, OUTCH, H, W), out_bf16.shape
    assert bool(jnp.allclose(out_bf16, ref, atol=2e-2, rtol=2e-2)), \
        float(jnp.max(jnp.abs(out_bf16 - ref)))

    print("KERNEL_OK")
</pallas_src>

<mosaic_0001>
module attributes {stable_mosaic.version = 11 : i64} {
  func.func @_core_kernel(%arg0: i32, %arg1: i32, %arg2: memref<1x1x512xf32, #tpu.memory_space<vmem>>, %arg3: memref<32x16xf32, #tpu.memory_space<vmem>>, %arg4: memref<32x1xf32, #tpu.memory_space<vmem>>, %arg5: memref<1x32x384xf32, #tpu.memory_space<vmem>>, %arg6: memref<16x384xf32, #tpu.memory_space<vmem>>) attributes {dimension_semantics = [#tpu.dimension_semantics<parallel>, #tpu.dimension_semantics<arbitrary>], iteration_bounds = array<i64: 2, 1>, scalar_prefetch = 0 : i64, scratch_operands = 1 : i64, tpu.core_type = #tpu.core_type<tc>, window_params = [{transform_indices = @transform_0, window_bounds = array<i64: 1, 1, 512>}, {pipeline_mode = #tpu.pipeline_mode<synchronous>, transform_indices = @transform_1, window_bounds = array<i64: 32, 16>}, {pipeline_mode = #tpu.pipeline_mode<synchronous>, transform_indices = @transform_2, window_bounds = array<i64: 32, 1>}, {transform_indices = @transform_3, window_bounds = array<i64: 1, 32, 384>}]} {
    %cst = arith.constant 0.000000e+00 : f32
    %0 = vector.broadcast %cst : f32 to vector<7x384xf32>
    %c9 = arith.constant 9 : index
    %c0 = arith.constant 0 : index
    %1 = vector.load %arg6[%c9, %c0] : memref<16x384xf32, #tpu.memory_space<vmem>>, vector<7x384xf32>
    tpu.vector_store %arg6[%c9, %c0], %0 {strides = array<i32>} : memref<16x384xf32, #tpu.memory_space<vmem>>, vector<7x384xf32>,
    %c0_0 = arith.constant 0 : index
    %c0_1 = arith.constant 0 : index
    %c0_2 = arith.constant 0 : index
    %2 = vector.load %arg2[%c0_0, %c0_1, %c0_2] : memref<1x1x512xf32, #tpu.memory_space<vmem>>, vector<1x1x384xf32>
    %3 = vector.shape_cast %2 : vector<1x1x384xf32> to vector<1x384xf32>
    %c0_3 = arith.constant 0 : index
    %c0_4 = arith.constant 0 : index
    %4 = vector.load %arg6[%c0_3, %c0_4] : memref<16x384xf32, #tpu.memory_space<vmem>>, vector<1x384xf32>
    tpu.vector_store %arg6[%c0_3, %c0_4], %3 {strides = array<i32>} : memref<16x384xf32, #tpu.memory_space<vmem>>, vector<1x384xf32>,
    %c0_5 = arith.constant 0 : index
    %c0_6 = arith.constant 0 : index
    %c1 = arith.constant 1 : index
    %5 = vector.load %arg2[%c0_5, %c0_6, %c1] : memref<1x1x512xf32, #tpu.memory_space<vmem>>, vector<1x1x384xf32>
    %6 = vector.shape_cast %5 : vector<1x1x384xf32> to vector<1x384xf32>
    %c1_7 = arith.constant 1 : index
    %c0_8 = arith.constant 0 : index
    %7 = vector.load %arg6[%c1_7, %c0_8] : memref<16x384xf32, #tpu.memory_space<vmem>>, vector<1x384xf32>
    tpu.vector_store %arg6[%c1_7, %c0_8], %6 {strides = array<i32>} : memref<16x384xf32, #tpu.memory_space<vmem>>, vector<1x384xf32>,
    %c0_9 = arith.constant 0 : index
    %c0_10 = arith.constant 0 : index
    %c2 = arith.constant 2 : index
    %8 = vector.load %arg2[%c0_9, %c0_10, %c2] : memref<1x1x512xf32, #tpu.memory_space<vmem>>, vector<1x1x384xf32>
    %9 = vector.shape_cast %8 : vector<1x1x384xf32> to vector<1x384xf32>
    %c2_11 = arith.constant 2 : index
    %c0_12 = arith.constant 0 : index
    %10 = vector.load %arg6[%c2_11, %c0_12] : memref<16x384xf32, #tpu.memory_space<vmem>>, vector<1x384xf32>
    tpu.vector_store %arg6[%c2_11, %c0_12], %9 {strides = array<i32>} : memref<16x384xf32, #tpu.memory_space<vmem>>, vector<1x384xf32>,
    %c0_13 = arith.constant 0 : index
    %c0_14 = arith.constant 0 : index
    %c18 = arith.constant 18 : index
    %11 = vector.load %arg2[%c0_13, %c0_14, %c18] : memref<1x1x512xf32, #tpu.memory_space<vmem>>, vector<1x1x384xf32>
    %12 = vector.shape_cast %11 : vector<1x1x384xf32> to vector<1x384xf32>
    %c3 = arith.constant 3 : index
    %c0_15 = arith.constant 0 : index
    %13 = vector.load %arg6[%c3, %c0_15] : memref<16x384xf32, #tpu.memory_space<vmem>>, vector<1x384xf32>
    tpu.vector_store %arg6[%c3, %c0_15], %12 {strides = array<i32>} : memref<16x384xf32, #tpu.memory_space<vmem>>, vector<1x384xf32>,
    %c0_16 = arith.constant 0 : index
    %c0_17 = arith.constant 0 : index
    %c19 = arith.constant 19 : index
    %14 = vector.load %arg2[%c0_16, %c0_17, %c19] : memref<1x1x512xf32, #tpu.memory_space<vmem>>, vector<1x1x384xf32>
    %15 = vector.shape_cast %14 : vector<1x1x384xf32> to vector<1x384xf32>
    %c4 = arith.constant 4 : index
    %c0_18 = arith.constant 0 : index
    %16 = vector.load %arg6[%c4, %c0_18] : memref<16x384xf32, #tpu.memory_space<vmem>>, vector<1x384xf32>
    tpu.vector_store %arg6[%c4, %c0_18], %15 {strides = array<i32>} : memref<16x384xf32, #tpu.memory_space<vmem>>, vector<1x384xf32>,
    %c0_19 = arith.constant 0 : index
    %c0_20 = arith.constant 0 : index
    %c20 = arith.constant 20 : index
    %17 = vector.load %arg2[%c0_19, %c0_20, %c20] : memref<1x1x512xf32, #tpu.memory_space<vmem>>, vector<1x1x384xf32>
    %18 = vector.shape_cast %17 : vector<1x1x384xf32> to vector<1x384xf32>
    %c5 = arith.constant 5 : index
    %c0_21 = arith.constant 0 : index
    %19 = vector.load %arg6[%c5, %c0_21] : memref<16x384xf32, #tpu.memory_space<vmem>>, vector<1x384xf32>
    tpu.vector_store %arg6[%c5, %c0_21], %18 {strides = array<i32>} : memref<16x384xf32, #tpu.memory_space<vmem>>, vector<1x384xf32>,
    %c0_22 = arith.constant 0 : index
    %c0_23 = arith.constant 0 : index
    %c36 = arith.constant 36 : index
    %20 = vector.load %arg2[%c0_22, %c0_23, %c36] : memref<1x1x512xf32, #tpu.memory_space<vmem>>, vector<1x1x384xf32>
    %21 = vector.shape_cast %20 : vector<1x1x384xf32> to vector<1x384xf32>
    %c6 = arith.constant 6 : index
    %c0_24 = arith.constant 0 : index
    %22 = vector.load %arg6[%c6, %c0_24] : memref<16x384xf32, #tpu.memory_space<vmem>>, vector<1x384xf32>
    tpu.vector_store %arg6[%c6, %c0_24], %21 {strides = array<i32>} : memref<16x384xf32, #tpu.memory_space<vmem>>, vector<1x384xf32>,
    %c0_25 = arith.constant 0 : index
    %c0_26 = arith.constant 0 : index
    %c37 = arith.constant 37 : index
    %23 = vector.load %arg2[%c0_25, %c0_26, %c37] : memref<1x1x512xf32, #tpu.memory_space<vmem>>, vector<1x1x384xf32>
    %24 = vector.shape_cast %23 : vector<1x1x384xf32> to vector<1x384xf32>
    %c7 = arith.constant 7 : index
    %c0_27 = arith.constant 0 : index
    %25 = vector.load %arg6[%c7, %c0_27] : memref<16x384xf32, #tpu.memory_space<vmem>>, vector<1x384xf32>
    tpu.vector_store %arg6[%c7, %c0_27], %24 {strides = array<i32>} : memref<16x384xf32, #tpu.memory_space<vmem>>, vector<1x384xf32>,
    %c0_28 = arith.constant 0 : index
    %c0_29 = arith.constant 0 : index
    %c38 = arith.constant 38 : index
    %26 = vector.load %arg2[%c0_28, %c0_29, %c38] : memref<1x1x512xf32, #tpu.memory_space<vmem>>, vector<1x1x384xf32>
    %27 = vector.shape_cast %26 : vector<1x1x384xf32> to vector<1x384xf32>
    %c8 = arith.constant 8 : index
    %c0_30 = arith.constant 0 : index
    %28 = vector.load %arg6[%c8, %c0_30] : memref<16x384xf32, #tpu.memory_space<vmem>>, vector<1x384xf32>
    tpu.vector_store %arg6[%c8, %c0_30], %27 {strides = array<i32>} : memref<16x384xf32, #tpu.memory_space<vmem>>, vector<1x384xf32>,
    %c0_31 = arith.constant 0 : index
    %c0_32 = arith.constant 0 : index
    %29 = vector.load %arg3[%c0_31, %c0_32] : memref<32x16xf32, #tpu.memory_space<vmem>>, vector<32x16xf32>
    %c0_33 = arith.constant 0 : index
    %c0_34 = arith.constant 0 : index
    %30 = vector.load %arg6[%c0_33, %c0_34] : memref<16x384xf32, #tpu.memory_space<vmem>>, vector<16x384xf32>
    %cst_35 = arith.constant dense<0.000000e+00> : vector<32x384xf32>
    %31 = tpu.matmul %29, %30, %cst_35 {dimension_numbers = #tpu.dot_dimension_numbers<[1], [0], [0], [1], [0, 0, 1, 1], [], []>} : vector<32x16xf32>, vector<16x384xf32>, vector<32x384xf32> -> vector<32x384xf32>
    %c0_36 = arith.constant 0 : index
    %c0_37 = arith.constant 0 : index
    %32 = vector.load %arg4[%c0_36, %c0_37] : memref<32x1xf32, #tpu.memory_space<vmem>>, vector<32x1xf32>
    %33 = vector.broadcast %32 : vector<32x1xf32> to vector<32x384xf32>
    %34 = arith.addf %31, %33 : vector<32x384xf32>
    %cst_38 = arith.constant 0.000000e+00 : f32
    %35 = vector.broadcast %cst_38 : f32 to vector<32x384xf32>
    %36 = arith.maximumf %34, %35 : vector<32x384xf32>
    %c0_39 = arith.constant 0 : index
    %c0_40 = arith.constant 0 : index
    %c0_41 = arith.constant 0 : index
    %37 = vector.load %arg5[%c0_39, %c0_40, %c0_41] : memref<1x32x384xf32, #tpu.memory_space<vmem>>, vector<1x32x384xf32>
    %38 = vector.shape_cast %37 : vector<1x32x384xf32> to vector<32x384xf32>
    %39 = vector.shape_cast %36 : vector<32x384xf32> to vector<1x32x384xf32>
    tpu.vector_store %arg5[%c0_39, %c0_40, %c0_41], %39 {strides = array<i32>} : memref<1x32x384xf32, #tpu.memory_space<vmem>>, vector<1x32x384xf32>,
    return
  }
  func.func @transform_0(%arg0: i32, %arg1: i32) -> (i32, i32, i32) {
    %c0_i32 = arith.constant 0 : i32
    %c0_i32_0 = arith.constant 0 : i32
    %c0_i32_1 = arith.constant 0 : i32
    return %arg0, %c0_i32, %c0_i32_0 : i32, i32, i32
  }
  func.func @transform_1(%arg0: i32, %arg1: i32) -> (i32, i32) {
    %c0_i32 = arith.constant 0 : i32
    %c0_i32_0 = arith.constant 0 : i32
    %c0_i32_1 = arith.constant 0 : i32
    return %c0_i32, %c0_i32_0 : i32, i32
  }
  func.func @transform_2(%arg0: i32, %arg1: i32) -> (i32, i32) {
    %c0_i32 = arith.constant 0 : i32
    %c0_i32_0 = arith.constant 0 : i32
    %c0_i32_1 = arith.constant 0 : i32
    return %c0_i32, %c0_i32_0 : i32, i32
  }
  func.func @transform_3(%arg0: i32, %arg1: i32) -> (i32, i32, i32) {
    %c0_i32 = arith.constant 0 : i32
    %c0_i32_0 = arith.constant 0 : i32
    return %arg0, %c0_i32, %arg1 : i32, i32, i32
  }
}

</mosaic_0001>

<bundles_post_ra>
// kernel: tpu_custom_call.1
= control target key start
LH: loop header
LB: loop body
LE: loop exit
PB: predicated region body
PF: predicated region fallthrough
CT: control target
= control target key end

     0   :  { %8 = vsyncpa [#allocation4], 0  ;;  %s1026_s0 = inlined_call_operand.vmem [shape: f32[2,1,512], index: 0, kind: input, shape index: {}]   ;;  %s1027_s1 = inlined_call_operand.vmem [shape: f32[32,16], index: 1, kind: input, shape index: {}]   ;;  %s1028_s2 = inlined_call_operand.vmem [shape: f32[32,1], index: 2, kind: input, shape index: {}]   ;;  %s1029_s3 = inlined_call_operand.hbm [shape: f32[2,32,384], index: 3, kind: output, shape index: {}]  }
   0x1   :  { %10 = vsyncpa [#allocation4 + $0x1], 0  ;;  %s832_s12 = smov 0   ;;  %s834_s13 = smov 0  }
   0x2   :  { %s836_s14 = smov 0   ;;  %s838_s15 = smov 0  }
   0x3   :  { %s840_s16 = smov 0   ;;  %s842_s17 = smov 0  }
   0x4 LB: > { %s613_s18 = sadd.s32 4294967295, %s797_s17   ;;  %s614_s19 = sadd.s32 4294967294, %s797_s17   ;;  %s797_s17 = sphi %s842_s17, %s16_s17   ;;  %s793_s16 = sphi %s840_s16, %s1038_s16   ;;  %s789_s15 = sphi %s838_s15, %s1037_s15   ;;  %s785_s14 = sphi %s836_s14, %s1036_s14   ;;  %s781_s13 = sphi %s834_s13, %s1035_s13   ;;  %s777_s12 = sphi %s832_s12, %s1034_s12  }
   0x5   : > { %s28_s20 = sadd.s32 1, %s793_s16  ;;  %s105_s21 = sadd.s32 1, %s785_s14 }
   0x6   : > { %p30_p0 = scmp.ge.s32.totalorder %s28_s20, 2  ;;  %p115_p1 = scmp.ne.s32.totalorder %s785_s14, %s781_s13 }
   0x7   : > { %p116_p2 = scmp.eq.s32.totalorder %s613_s18, 1  ;;  %p121_p3 = scmp.ne.s32.totalorder %s781_s13, %s777_s12 }
   0x8   : > { %s1040_s20 = smov (%p30_p0, %s28_s20), 0  ;;  %p122_p5 = scmp.eq.s32.totalorder %s614_s19, 1 }
   0x9   : > { %p872_p4 = por %p116_p2, %p115_p1  ;;  %s100_s23 = ssub.s32 %s793_s16, %s1040_s20 }
   0xa   : > { %p617_p6 = scmp.ge.s32.totalorder %s797_s17, 1  ;;  %p103_p7 = scmp.eq.s32.totalorder %s100_s23, 0 }
   0xb   : > { %p879_p8 = por %p122_p5, %p121_p3  ;;  %p153_p9 = scmp.lt.s32.totalorder %s797_s17, 3 }
   0xc   : > { %s885_s25 = scalar_select %p103_p7, %s785_s14, %s105_s21  }
   0xd   : > { %p154_p10 = pnand %p617_p6, %p153_p9 }
   0xe   : > { %p176_p11 = scmp.lt.s32.totalorder (!%p154_p10), %s789_s15, 1  ;;  %s800_s4 = smov (!%p154_p10), 90  }
   0xf   : > { %157 = sbr.rel (%p154_p10) target bundleno = 388 (0x184), region = 32  ;;  %s801_s5 = smov (!%p154_p10), 126  }
  0x10   : > { %s802_s6 = smov (!%p154_p10), 110   ;;  %s803_s7 = smov (!%p154_p10), 127  }
  0x11   : > { %s804_s8 = smov (!%p154_p10), 108   ;;  %s805_s9 = smov (!%p154_p10), 109  }
  0x12   : > { %s806_s10 = smov (!%p154_p10), 91   ;;  %s807_s11 = smov (!%p154_p10), 92  }
  0x13   : > { %s651_s21 = smul.u32 (!%p154_p10), 1536, %s789_s15 }
  0x14   : > { %s177_s26 = scalar_select %p176_p11, %s789_s15, 1  ;;  %v799_v0 = vmov 0.0   ;;  %v185_v1 = vlaneseq  ;;  %v289_v12 = vld [vmem:[%s1028_s2] sm:$0xff]  ;;  %v290_v13 = vld [vmem:[%s1028_s2 + $0x8] sm:$0xff]  ;;  %v808_v14 = vmov 0   ;;  %v292_v15 = vld [vmem:[%s1028_s2 + $0x18] sm:$0xff] }
  0x15   : > { %182 = vst [vmem:[#allocation2 + $0x20] sm:$0xfe] %v799_v0  ;;  %181 = vst [vmem:[#allocation2 + $0x18] sm:$0xfe] %v799_v0  ;;  %390 = vmatprep.mubr.f32.mxu0 %v799_v0  ;;  %408 = vmatprep.mubr.f32.mxu1 %v799_v0  ;;  %v291_v16 = vld [vmem:[%s1028_s2 + $0x10] sm:$0xff]  ;;  %vm273_vm1 = vcmask 736256  }
  0x16   : > { %183 = vst [vmem:[#allocation2 + $0x28] sm:$0xfe] %v799_v0  ;;  %s618_s27 = sshll.u32 %s177_s26, 2  ;;  %vm897_vm0 = vcmp.lt.s32.totalorder %v185_v1, 384  ;;  %719 = vset.pattern.permute.xlu0 %v808_v14  ;;  %720 = vset.pattern.permute.xlu1 %v808_v14  ;;  %vm207_vm2 = vcmask 1031168   ;;  %vm218_vm3 = vcmask 900096  }
  0x17   : > { %s179_s30 = scalar_lea.vmem %s1026_s0, %s618_s27  ;;  %vm196_vm4 = vcmask 1039360   ;;  %vm240_vm5 = vcmask 883712   ;;  %vm229_vm6 = vcmask 891904   ;;  %vm262_vm7 = vcmask 744448   ;;  %v279_v43 = vld [vmem:[%s1027_s1] sm:$0xff]  ;;  %v282_v46 = vld [vmem:[%s1027_s1 + $0x18] sm:$0xff]  ;;  %s972_s27 = scalar_lea.hbm %s1029_s3, %s651_s21 }
  0x18   : > { %v268_v2 = vld [vmem:[%s179_s30] sm:$0xf]  ;;  %vm251_vm8 = vcmask 752640   ;;  %vm313_vm9 = vcmask 130048   ;;  %v280_v48 = vld [vmem:[%s1027_s1 + $0x8] sm:$0xff]  ;;  %v281_v50 = vld [vmem:[%s1027_s1 + $0x10] sm:$0xff] }
  0x19   : > { %v202_v3 = vld [vmem:[%s179_s30] sm:$0xf]  ;;  %270 = vrot.lane.b32.xlu0 %v268_v2, %s800_s4 }
  0x1a   : > { %204 = vrot.lane.b32.xlu1 %v202_v3, %s801_s5  ;;  %v213_v4 = vld [vmem:[%s179_s30] sm:$0xf] }
  0x1b   : > { %v191_v5 = vld [vmem:[%s179_s30] sm:$0xf] }
  0x1c   : > { %v184_v7 = vld [vmem:[%s179_s30] sm:$0x7] }
  0x1d   : > { %189 = vst.msk [vmem:[#allocation2] ss:$8 sm:$0x7] %vm897_vm0, %v184_v7  ;;  %193 = vrot.lane.b32.xlu0 %v191_v5, %s803_s7  ;;  %v235_v8 = vld [vmem:[%s179_s30] sm:$0xf] }
  0x1e   : > { %215 = vrot.lane.b32.xlu1 %v213_v4, %s802_s6  ;;  %v224_v9 = vld [vmem:[%s179_s30] sm:$0xf] }
  0x1f   : > { %v257_v10 = vld [vmem:[%s179_s30] sm:$0xf] }
  0x20   : > { %v246_v11 = vld [vmem:[%s179_s30] sm:$0xf]  ;;  %s809_s30 = smov [#allocation3]  }
  0x21   : > { %226 = vrot.lane.b32.xlu0 %v224_v9, %s805_s9  ;;  %s725_s4 = sshll.u32 %s809_s30, 4  ;;  %s726_s4 = int_to_ptr.vmem [resolvable:$false] %s725_s4 }
  0x22   : > { %237 = vrot.lane.b32.xlu1 %v235_v8, %s804_s8  ;;  %s727_s5 = scalar_lea.vmem %s726_s4, 3072 }
  0x25   : > { %248 = vrot.lane.b32.xlu0 %v246_v11, %s807_s11  ;;  %s173_s11 = sand.u32 1, %s781_s13  }
  0x26   : > { %259 = vrot.lane.b32.xlu1 %v257_v10, %s806_s10  ;;  %s650_s18 = smul.u32 96, %s173_s11  ;;  %s981_s28 = scalar_lea.sflag [#allocation4], %s173_s11 }
  0x28   : > { %s956_s19 = scalar_lea.vmem [#allocation3], %s650_s18 }
  0x29   : > { %295 = vperm.xlu0 %719, %v289_v12   ;;  %s540_s23 = sshll.u32 %s956_s19, 4  ;;  %s974_s23 = int_to_ptr.vmem [resolvable:$true] %s540_s23 }
  0x2a   : > { %300 = vperm.xlu1 %720, %v290_v13   ;;  %s721_s29 = scalar_lea.vmem %s974_s23, 1536  ;;  %p728_p1 = scmp.lt.s32.totalorder %s974_s23, %s726_s4 }
  0x2b   : > { %p722_p12 = scmp.ne.s32.totalorder %s974_s23, %s721_s29  ;;  %p729_p2 = scmp.lt.s32.totalorder %s727_s5, %s721_s29 }
  0x2d   : > { %310 = vperm.xlu0 %719, %v292_v15   ;;  %p723_p13 = pnand %p722_p12, %p872_p4  ;;  %p730_p3 = por %p729_p2, %p728_p1 }
  0x2e   : > { %305 = vperm.xlu1 %720, %v291_v16  }
  0x2f   : > { %p724_p0 = pneg %p723_p13 }
  0x31   : > { %p731_p5 = pnand %p730_p3, %p724_p0 }
  0x8b   : > { %v271_v17 = vpop.permute.xlu0 %270 }
  0x8c   : > { %v205_v18 = vpop.permute.xlu1 %204  ;;  %v272_v19 = vrot.slane %v271_v17, 1 }
  0x8d   : > { %v206_v20 = vrot.slane %v205_v18, 1 }
  0x8e   : > { %v274_v21 = vsel %vm273_vm1, %v271_v17, %v272_v19 }
  0x8f   : > { %v208_v22 = vsel %vm207_vm2, %v205_v18, %v206_v20  ;;  %277 = vst.msk [vmem:[#allocation2 + $0x18] ss:$8 sm:$0x7] %vm897_vm0, %v274_v21  ;;  %v194_v24 = vpop.permute.xlu0 %193 }
  0x90   : > { %211 = vst.msk [vmem:[#allocation2 + $0x2] ss:$8 sm:$0x7] %vm897_vm0, %v208_v22  ;;  %v216_v23 = vpop.permute.xlu1 %215  ;;  %v195_v26 = vrot.slane %v194_v24, 1 }
  0x91   : > { %v217_v25 = vrot.slane %v216_v23, 1 }
  0x92   : > { %v197_v28 = vsel %vm196_vm4, %v194_v24, %v195_v26 }
  0x93   : > { %v219_v27 = vsel %vm218_vm3, %v216_v23, %v217_v25  ;;  %200 = vst.msk [vmem:[#allocation2 + $0x1] ss:$8 sm:$0x7] %vm897_vm0, %v197_v28  ;;  %v227_v30 = vpop.permute.xlu0 %226 }
  0x94   : > { %222 = vst.msk [vmem:[#allocation2 + $0x3] ss:$8 sm:$0x7] %vm897_vm0, %v219_v27  ;;  %v238_v29 = vpop.permute.xlu1 %237  ;;  %v228_v32 = vrot.slane %v227_v30, 1 }
  0x95   : > { %v239_v31 = vrot.slane %v238_v29, 1 }
  0x96   : > { %v230_v34 = vsel %vm229_vm6, %v227_v30, %v228_v32  ;;  %v287_v35 = vld [vmem:[#allocation2 + $0x20] sm:$0xff]  ;;  %v286_v36 = vld [vmem:[#allocation2 + $0x18] sm:$0xff]  ;;  %v288_v47 = vld [vmem:[#allocation2 + $0x28] sm:$0xff] }
  0x97   : > { %v241_v33 = vsel %vm240_vm5, %v238_v29, %v239_v31  ;;  %233 = vst.msk [vmem:[#allocation2 + $0x4] ss:$8 sm:$0x7] %vm897_vm0, %v230_v34  ;;  %354 = vmatprep.subr.mxu0 %v287_v35  ;;  %646 = vmatprep.subr.mxu1 %v287_v35  ;;  %v249_v38 = vpop.permute.xlu0 %248 }
  0x98   : > { %244 = vst.msk [vmem:[#allocation2 + $0x5] ss:$8 sm:$0x7] %vm897_vm0, %v241_v33  ;;  %v260_v37 = vpop.permute.xlu1 %259  ;;  %v250_v40 = vrot.slane %v249_v38, 1  ;;  %355 = vmatpush1.msra.mxu0 %v286_v36  ;;  %648 = vmatpush1.msra.mxu1 %v286_v36 }
  0x99   : > { %v261_v39 = vrot.slane %v260_v37, 1 }
  0x9a   : > { %v252_v42 = vsel %vm251_vm8, %v249_v38, %v250_v40 }
  0x9b   : > { %v263_v41 = vsel %vm262_vm7, %v260_v37, %v261_v39  ;;  %255 = vst.msk [vmem:[#allocation2 + $0x6] ss:$8 sm:$0x7] %vm897_vm0, %v252_v42 }
  0x9c   : > { %266 = vst.msk [vmem:[#allocation2 + $0x7] ss:$8 sm:$0x7] %vm897_vm0, %v263_v41 }
  0xa3   : > { %v284_v44 = vld [vmem:[#allocation2 + $0x8] sm:$0xff]  ;;  %v283_v45 = vld [vmem:[#allocation2] sm:$0xff]  ;;  %v285_v49 = vld [vmem:[#allocation2 + $0x10] sm:$0xff] }
  0xa4   : > { %356 = vmatprep.subr.mxu0 %v284_v44  ;;  %647 = vmatprep.subr.mxu1 %v284_v44  ;;  %v296_v51 = vpop.permute.xlu0 %295 }
  0xa5   : > { %357 = vmatpush1.msra.mxu0 %v283_v45  ;;  %649 = vmatpush1.msra.mxu1 %v283_v45  ;;  %v301_v57 = vpop.permute.xlu1 %300 }
  0xa6   : > { %619 = vmatmul.mubr.msk.f32.vlgmr.msra.gmra.mxu0 %vm313_vm9, %v279_v43  ;;  %622 = vmatmul.mubr.msk.f32.vlgmr.msra.gmra.mxu1 %vm313_vm9, %v282_v46 }
  0xa7   : > { %636 = vmatprep.subr.mxu1 %v288_v47  ;;  %396 = vmatprep.mubr.f32.mxu0 %v799_v0 }
  0xa8   : > { %637 = vmatpush3.msra.mxu1 %v288_v47  ;;  %640 = vmatprep.mubr.msk.f32.mxu1 %vm313_vm9, %v279_v43  ;;  %v311_v52 = vpop.permute.xlu0 %310 }
  0xa9   : > { %638 = vmatprep.subr.mxu1 %v285_v49  ;;  %v306_v12 = vpop.permute.xlu1 %305 }
  0xaa   : > { %639 = vmatpush3.msra.mxu1 %v285_v49  ;;  %620 = vmatmul.mubr.msk.f32.gmra.mxu0 %vm313_vm9, %v280_v48 }
  0xab   : > { %641 = vmatmul.mubr.msk.f32.vlgmr.msra.gmra.mxu1 %vm313_vm9, %v280_v48  ;;  %402 = vmatprep.mubr.f32.mxu0 %v799_v0 }
  0xac   : > { %643 = vmatprep.mubr.msk.f32.mxu1 %vm313_vm9, %v281_v50 }
  0xae   : > { %621 = vmatmul.mubr.msk.f32.gmra.mxu0 %vm313_vm9, %v281_v50 }
  0xaf   : > { %644 = vmatmul.mubr.msk.f32.gmra.mxu1 %vm313_vm9, %v282_v46 }
 0x166   : > { %v392_v53 = vpop.f32.mrf.mxu0  ;;  %v410_v54 = vpop.f32.mrf.mxu1 }
 0x167   : > { %v393_v55 = vadd.f32 %v392_v53, %v296_v51  ;;  %v411_v56 = vadd.f32 %v410_v54, %v311_v52 }
 0x168   : > { %v394_v58 = vpop.f32.mrf.mxu0  ;;  %v412_v59 = vpop.f32.mrf.mxu1 }
 0x169   : > { %v500_v60 = vmax.f32 %v393_v55, 0.0  ;;  %v509_v61 = vmax.f32 %v411_v56, 0.0  ;;  %v395_v62 = vadd.f32 %v394_v58, %v296_v51  ;;  %v413_v63 = vadd.f32 %v412_v59, %v311_v52 }
 0x16a   : > { %v398_v0 = vpop.f32.mrf.mxu0 }
 0x16b   : > { %512 = vst [vmem:[%s956_s19] sm:$0xff] %v500_v60  ;;  %521 = vst [vmem:[%s956_s19 + $0x48] sm:$0xff] %v509_v61  ;;  %v501_v1 = vmax.f32 %v395_v62, 0.0  ;;  %v510_v2 = vmax.f32 %v413_v63, 0.0  ;;  %v399_v3 = vadd.f32 %v398_v0, %v301_v57  ;;  %v642_v4 = vpop.f32.mrf.mxu1 }
 0x16c   : > { %v487_v5 = vadd.f32 %v642_v4, %v301_v57  ;;  %v400_v6 = vpop.f32.mrf.mxu0 }
 0x16d   : > { %513 = vst [vmem:[%s956_s19 + $0x8] sm:$0xff] %v501_v1  ;;  %522 = vst [vmem:[%s956_s19 + $0x50] sm:$0xff] %v510_v2  ;;  %v503_v7 = vmax.f32 %v399_v3, 0.0  ;;  %v401_v8 = vadd.f32 %v400_v6, %v301_v57  ;;  %v481_v9 = vpop.f32.mrf.mxu1 }
 0x16e   : > { %v505_v10 = vmax.f32 %v487_v5, 0.0  ;;  %v482_v11 = vadd.f32 %v481_v9, %v296_v51  ;;  %v404_v13 = vpop.f32.mrf.mxu0 }
 0x16f   : > { %515 = vst [vmem:[%s956_s19 + $0x18] sm:$0xff] %v503_v7  ;;  %v504_v14 = vmax.f32 %v401_v8, 0.0  ;;  %v405_v15 = vadd.f32 %v404_v13, %v306_v12  ;;  %v645_v16 = vpop.f32.mrf.mxu1 }
 0x170   : > { %517 = vst [vmem:[%s956_s19 + $0x28] sm:$0xff] %v505_v10  ;;  %v502_v17 = vmax.f32 %v482_v11, 0.0  ;;  %v497_v18 = vadd.f32 %v645_v16, %v311_v52  ;;  %v406_v19 = vpop.f32.mrf.mxu0 }
 0x171   : > { %516 = vst [vmem:[%s956_s19 + $0x20] sm:$0xff] %v504_v14  ;;  %v506_v20 = vmax.f32 %v405_v15, 0.0  ;;  %v407_v21 = vadd.f32 %v406_v19, %v306_v12  ;;  %v491_v22 = vpop.f32.mrf.mxu1 }
 0x172   : > { %514 = vst [vmem:[%s956_s19 + $0x10] sm:$0xff] %v502_v17  ;;  %v511_v23 = vmax.f32 %v497_v18, 0.0  ;;  %v492_v24 = vadd.f32 %v491_v22, %v306_v12 }
 0x173   : > { %518 = vst [vmem:[%s956_s19 + $0x30] sm:$0xff] %v506_v20  ;;  %v507_v25 = vmax.f32 %v407_v21, 0.0 }
 0x174   : > { %523 = vst [vmem:[%s956_s19 + $0x58] sm:$0xff] %v511_v23  ;;  %v508_v26 = vmax.f32 %v492_v24, 0.0 }
 0x175   : > { %519 = vst [vmem:[%s956_s19 + $0x38] sm:$0xff] %v507_v25 }
 0x176   : > { %520 = vst [vmem:[%s956_s19 + $0x40] sm:$0xff] %v508_v26 }
 0x177   : > { %734 = shalt.err (!%p731_p5)
}
 0x178   : > { %s735_s6 = scalar_lea.hbm %s972_s27, 1536  ;;  %s739_s9 = scalar_lea.hbm %s1029_s3, 3072 }
 0x179   : > { %p736_p6 = scmp.ne.s32.totalorder %s972_s27, %s735_s6  ;;  %p740_p10 = scmp.lt.s32.totalorder %s972_s27, %s1029_s3 }
 0x17a   : > { %p741_p11 = scmp.lt.s32.totalorder %s739_s9, %s735_s6 }
 0x17b   : > { %p737_p7 = pnand %p736_p6, %p872_p4 }
 0x17c   : > { %p742_p12 = por %p741_p11, %p740_p10 }
 0x17d   : > { %p738_p9 = pneg %p737_p7 }
 0x17f   : > { %p743_p13 = pnand %p742_p12, %p738_p9 }
 0x181   : > { %746 = shalt.err (!%p743_p13)
}
 0x182   : > { %s810_s18 = smov 384   ;;  %s811_s19 = smov 24  }
 0x183   : > { %652 = dma.vmem_to_hbm [thread:$0]  (%p872_p4), %s974_s23, 1536, %s972_s27, %s981_s28, %s810_s18, %s810_s18, %s811_s19  }
 0x184 PF: > { %p658_p0 = scmp.ge.s32.totalorder %s797_s17, 2  ;;  %s555_s21 = sand.u32 1, %s777_s12  }
 0x185   : > { %s556_s15 = scalar_lea.sflag [#allocation4], %s555_s21 }
 0x186   : > { %p655_p1 = pnand %p658_p0, %p879_p8 }
 0x188   : > { %p656_p2 = pneg %p655_p1 }
 0x18a   : > { %772 = dma.done.wait (%p656_p2), %s556_s15, 1536  }
 0x18b   : > { %774 = vsyncadd (%p656_p2), %s556_s15, 4294965760  ;;  %s16_s17 = sadd.s32 1, %s797_s17   ;;  %s1034_s12 = smov %s781_s13 }
 0x18c   : > { %p13_p3 = scmp.ge.s32.totalorder %s16_s17, 4   ;;  %s1035_s13 = smov %s785_s14 }
 0x18d   : > { %s1036_s14 = smov %s885_s25  ;;  %s1037_s15 = smov %s793_s16 }
 0x18e   : > { %s1038_s16 = smov %s1040_s20  ;;  %15 = sbr.rel (!%p13_p3) target bundleno = 4 (0x4), region = 75 }
 0x193   :  { %561 = vsyncpa [#allocation4], 1 }
 0x194   :  { %563 = vsyncpa [#allocation4 + $0x1], 1 }

</bundles_post_ra>
